<compile_context>
chip_gen: v6e
topology: v6e:2x2x1
jax: 0.10.0
libtpu: 0.0.40
codegen_flags: <defaults>
</compile_context>

<pallas_src>
import jax
import jax.numpy as jnp
from jax.experimental import pallas as pl
from jax.experimental.pallas import tpu as pltpu

LANES = 128  # lane-pad all feature dims to this width


def _round_up(x, m):
    return ((x + m - 1) // m) * m


def _pad2(x, rows, cols):
    r, c = x.shape
    return jnp.pad(x, ((0, rows - r), (0, cols - c)))


# ---------------- fused Pallas kernel ----------------

def make_fused_gcn_kernel(layer_dims):
    """layer_dims: list of (true_f_in, true_f_out) per GCN layer (un-padded)."""
    n_layers = len(layer_dims)

    def kernel(*refs):
        # refs = (a, x, m, w0, b0, ..., w_{L-1}, b_{L-1}, w_fc, b_fc, out)
        a_ref, x_ref, m_ref = refs[:3]
        wb_refs = refs[3:-1]
        o_ref = refs[-1]

        a = a_ref[...]                       # (N, N)   bf16, 0/1 symmetric adjacency
        m = m_ref[...]                       # (N, 1)   f32 node mask
        h = x_ref[...].astype(jnp.float32)   # (N, FP)  features (zero-padded lanes)

        for l in range(n_layers):
            w = wb_refs[2 * l][...]          # (FP, FP) bf16 (zero-padded)
            bias = wb_refs[2 * l + 1][...]   # (1, FP)  f32  (zero-padded)
            f_in, f_out = layer_dims[l]
            hb = h.astype(jnp.bfloat16)
            if f_in <= f_out:
                # propagate on the narrower input width: (A @ X) @ W
                s = jnp.dot(a, hb, preferred_element_type=jnp.float32)
                z = jnp.dot(s.astype(jnp.bfloat16), w,
                            preferred_element_type=jnp.float32)
            else:
                # propagate on the narrower output width: A @ (X @ W)
                y = jnp.dot(hb, w, preferred_element_type=jnp.float32)
                z = jnp.dot(a, y.astype(jnp.bfloat16),
                            preferred_element_type=jnp.float32)
            h = (z + bias) * m               # bias then mask (reference semantics)

        # Head: max over nodes, then FC.
        wf = wb_refs[2 * n_layers][...]      # (FP, FP) bf16
        bf = wb_refs[2 * n_layers + 1][...]  # (1, FP)  f32
        pooled = jnp.max(h, axis=0, keepdims=True)               # (1, FP)
        out = jnp.dot(pooled.astype(jnp.bfloat16), wf,
                      preferred_element_type=jnp.float32) + bf   # (1, FP)
        o_ref[...] = out.astype(o_ref.dtype)

    return kernel


# ---------------- parameter init (deterministic, torch nn.Linear-style) ----------------

def init_linear(key, fan_in, fan_out):
    kw, kb = jax.random.split(key)
    bound = 1.0 / (fan_in ** 0.5)
    w = jax.random.uniform(kw, (fan_in, fan_out), jnp.float32, -bound, bound)
    b = jax.random.uniform(kb, (1, fan_out), jnp.float32, -bound, bound)
    return w, b


def init_gcn_params(key, in_dim, out_dim, hidden_dim=(64, 32, 16)):
    dims = [in_dim] + list(hidden_dim)
    keys = jax.random.split(key, len(dims))
    layers = [init_linear(keys[i], dims[i], dims[i + 1]) for i in range(len(dims) - 1)]
    fc = init_linear(keys[-1], hidden_dim[-1], out_dim)
    return layers, fc


# ---------------- forward ----------------

@jax.jit
def gcn_forward(params, features, adj, mask):
    # features: (B, N, F_in); adj: (B, N, N); mask: (B, N) or (B, N, 1)
    layers, (fc_w, fc_b) = params
    if mask.ndim == 2:
        mask = mask[:, :, None]
    mask = mask.astype(jnp.float32)

    B, N, f_in0 = features.shape
    out_dim = fc_w.shape[1]
    layer_dims = [(w.shape[0], w.shape[1]) for (w, _) in layers]
    all_dims = [f_in0, out_dim] + [d for wd in layer_dims for d in wd]
    FP = _round_up(max(all_dims + [LANES]), LANES)

    # dgl.batch(numpy_to_graph(adj.T)) + update_all(copy_src, sum) == dense
    # per-graph propagation with binarized symmetric adjacency.  0/1 -> exact in bf16.
    a_prop = ((adj != 0) | (jnp.swapaxes(adj, 1, 2) != 0)).astype(jnp.bfloat16)

    # Lane-pad features / weights / biases to FP lanes (zero padding keeps results exact).
    x = jnp.pad(features, ((0, 0), (0, 0), (0, FP - f_in0))).astype(jnp.bfloat16)
    flat_inputs = [a_prop, x, mask]
    for (w, b) in layers:
        flat_inputs.append(_pad2(w, FP, FP).astype(jnp.bfloat16))
        flat_inputs.append(_pad2(b, 1, FP).astype(jnp.float32))
    flat_inputs.append(_pad2(fc_w, FP, FP).astype(jnp.bfloat16))
    flat_inputs.append(_pad2(fc_b, 1, FP).astype(jnp.float32))

    sq = pl.Squeezed()
    in_specs = [
        pl.BlockSpec((sq, N, N), lambda b: (b, 0, 0)),    # A_prop (bf16)
        pl.BlockSpec((sq, N, FP), lambda b: (b, 0, 0)),   # features (bf16)
        pl.BlockSpec((sq, N, 1), lambda b: (b, 0, 0)),    # mask (f32)
    ]
    for _ in range(len(layers) + 1):                      # layer weights + fc head
        in_specs.append(pl.BlockSpec((FP, FP), lambda b: (0, 0)))
        in_specs.append(pl.BlockSpec((1, FP), lambda b: (0, 0)))

    kernel = make_fused_gcn_kernel(layer_dims)

    out_padded = pl.pallas_call(
        kernel,
        out_shape=jax.ShapeDtypeStruct((B, 1, FP), jnp.float32),
        grid_spec=pltpu.PrefetchScalarGridSpec(
            num_scalar_prefetch=0,
            grid=(B,),
            in_specs=in_specs,
            out_specs=pl.BlockSpec((sq, 1, FP), lambda b: (b, 0, 0)),
        ),
        compiler_params=pltpu.CompilerParams(
            dimension_semantics=("parallel",),   # shard graphs across TCs on v7x
        ),
    )(*flat_inputs)

    # TODO(synk): nn.Dropout(p=0.2) before the fc is eval-mode identity; omitted.
    # torch .squeeze() after the max-pool is a no-op for B>1, out_dim>1.
    return out_padded.reshape(B, FP)[:, :out_dim]


if __name__ == "__main__":
    key = jax.random.PRNGKey(0)
    k_feat, k_adj, k_mask, k_param = jax.random.split(key, 4)

    B, N, F_in = 2, 16, 8
    out_dim = 4

    features = jax.random.normal(k_feat, (B, N, F_in), jnp.float32)
    adj = (jax.random.uniform(k_adj, (B, N, N)) > 0.7).astype(jnp.float32)
    mask = (jax.random.uniform(k_mask, (B, N)) > 0.2).astype(jnp.float32)

    params = init_gcn_params(k_param, F_in, out_dim)

    out = gcn_forward(params, features, adj, mask)
    jax.block_until_ready(out)
    assert out.shape == (B, out_dim), out.shape
    print("KERNEL_OK")
</pallas_src>

<mosaic_0001>
module attributes {stable_mosaic.version = 11 : i64} {
  func.func @kernel(%arg0: i32, %arg1: memref<1x16x16xbf16, #tpu.memory_space<vmem>>, %arg2: memref<1x16x128xbf16, #tpu.memory_space<vmem>>, %arg3: memref<1x16x1xf32, #tpu.memory_space<vmem>>, %arg4: memref<128x128xbf16, #tpu.memory_space<vmem>>, %arg5: memref<1x128xf32, #tpu.memory_space<vmem>>, %arg6: memref<128x128xbf16, #tpu.memory_space<vmem>>, %arg7: memref<1x128xf32, #tpu.memory_space<vmem>>, %arg8: memref<128x128xbf16, #tpu.memory_space<vmem>>, %arg9: memref<1x128xf32, #tpu.memory_space<vmem>>, %arg10: memref<128x128xbf16, #tpu.memory_space<vmem>>, %arg11: memref<1x128xf32, #tpu.memory_space<vmem>>, %arg12: memref<1x1x128xf32, #tpu.memory_space<vmem>>) attributes {dimension_semantics = [#tpu.dimension_semantics<parallel>], iteration_bounds = array<i64: 2>, scalar_prefetch = 0 : i64, scratch_operands = 0 : i64, tpu.core_type = #tpu.core_type<tc>, window_params = [{transform_indices = @transform_0, window_bounds = array<i64: 1, 16, 16>}, {transform_indices = @transform_1, window_bounds = array<i64: 1, 16, 128>}, {transform_indices = @transform_2, window_bounds = array<i64: 1, 16, 1>}, {pipeline_mode = #tpu.pipeline_mode<synchronous>, transform_indices = @transform_3, window_bounds = array<i64: 128, 128>}, {pipeline_mode = #tpu.pipeline_mode<synchronous>, transform_indices = @transform_4, window_bounds = array<i64: 1, 128>}, {pipeline_mode = #tpu.pipeline_mode<synchronous>, transform_indices = @transform_5, window_bounds = array<i64: 128, 128>}, {pipeline_mode = #tpu.pipeline_mode<synchronous>, transform_indices = @transform_6, window_bounds = array<i64: 1, 128>}, {pipeline_mode = #tpu.pipeline_mode<synchronous>, transform_indices = @transform_7, window_bounds = array<i64: 128, 128>}, {pipeline_mode = #tpu.pipeline_mode<synchronous>, transform_indices = @transform_8, window_bounds = array<i64: 1, 128>}, {pipeline_mode = #tpu.pipeline_mode<synchronous>, transform_indices = @transform_9, window_bounds = array<i64: 128, 128>}, {pipeline_mode = #tpu.pipeline_mode<synchronous>, transform_indices = @transform_10, window_bounds = array<i64: 1, 128>}, {transform_indices = @transform_11, window_bounds = array<i64: 1, 1, 128>}]} {
    %c0 = arith.constant 0 : index
    %c0_0 = arith.constant 0 : index
    %c0_1 = arith.constant 0 : index
    %0 = vector.load %arg1[%c0, %c0_0, %c0_1] : memref<1x16x16xbf16, #tpu.memory_space<vmem>>, vector<1x16x16xbf16>
    %1 = vector.shape_cast %0 : vector<1x16x16xbf16> to vector<16x16xbf16>
    %c0_2 = arith.constant 0 : index
    %c0_3 = arith.constant 0 : index
    %c0_4 = arith.constant 0 : index
    %2 = vector.load %arg3[%c0_2, %c0_3, %c0_4] : memref<1x16x1xf32, #tpu.memory_space<vmem>>, vector<1x16x1xf32>
    %3 = vector.shape_cast %2 : vector<1x16x1xf32> to vector<16x1xf32>
    %c0_5 = arith.constant 0 : index
    %c0_6 = arith.constant 0 : index
    %c0_7 = arith.constant 0 : index
    %4 = vector.load %arg2[%c0_5, %c0_6, %c0_7] : memref<1x16x128xbf16, #tpu.memory_space<vmem>>, vector<1x16x128xbf16>
    %5 = vector.shape_cast %4 : vector<1x16x128xbf16> to vector<16x128xbf16>
    %6 = arith.extf %5 : vector<16x128xbf16> to vector<16x128xf32>
    %c0_8 = arith.constant 0 : index
    %c0_9 = arith.constant 0 : index
    %7 = vector.load %arg4[%c0_8, %c0_9] : memref<128x128xbf16, #tpu.memory_space<vmem>>, vector<128x128xbf16>
    %c0_10 = arith.constant 0 : index
    %c0_11 = arith.constant 0 : index
    %8 = vector.load %arg5[%c0_10, %c0_11] : memref<1x128xf32, #tpu.memory_space<vmem>>, vector<1x128xf32>
    %9 = arith.truncf %6 : vector<16x128xf32> to vector<16x128xbf16>
    %cst = arith.constant dense<0.000000e+00> : vector<16x128xf32>
    %10 = tpu.matmul %1, %9, %cst {dimension_numbers = #tpu.dot_dimension_numbers<[1], [0], [0], [1], [0, 0, 1, 1], [], []>} : vector<16x16xbf16>, vector<16x128xbf16>, vector<16x128xf32> -> vector<16x128xf32>
    %11 = arith.truncf %10 : vector<16x128xf32> to vector<16x128xbf16>
    %cst_12 = arith.constant dense<0.000000e+00> : vector<16x128xf32>
    %12 = tpu.matmul %11, %7, %cst_12 {dimension_numbers = #tpu.dot_dimension_numbers<[1], [0], [0], [1], [0, 0, 1, 1], [], []>} : vector<16x128xbf16>, vector<128x128xbf16>, vector<16x128xf32> -> vector<16x128xf32>
    %13 = vector.broadcast %8 : vector<1x128xf32> to vector<16x128xf32>
    %14 = arith.addf %12, %13 : vector<16x128xf32>
    %15 = vector.broadcast %3 : vector<16x1xf32> to vector<16x128xf32>
    %16 = arith.mulf %14, %15 : vector<16x128xf32>
    %c0_13 = arith.constant 0 : index
    %c0_14 = arith.constant 0 : index
    %17 = vector.load %arg6[%c0_13, %c0_14] : memref<128x128xbf16, #tpu.memory_space<vmem>>, vector<128x128xbf16>
    %c0_15 = arith.constant 0 : index
    %c0_16 = arith.constant 0 : index
    %18 = vector.load %arg7[%c0_15, %c0_16] : memref<1x128xf32, #tpu.memory_space<vmem>>, vector<1x128xf32>
    %19 = arith.truncf %16 : vector<16x128xf32> to vector<16x128xbf16>
    %cst_17 = arith.constant dense<0.000000e+00> : vector<16x128xf32>
    %20 = tpu.matmul %19, %17, %cst_17 {dimension_numbers = #tpu.dot_dimension_numbers<[1], [0], [0], [1], [0, 0, 1, 1], [], []>} : vector<16x128xbf16>, vector<128x128xbf16>, vector<16x128xf32> -> vector<16x128xf32>
    %21 = arith.truncf %20 : vector<16x128xf32> to vector<16x128xbf16>
    %cst_18 = arith.constant dense<0.000000e+00> : vector<16x128xf32>
    %22 = tpu.matmul %1, %21, %cst_18 {dimension_numbers = #tpu.dot_dimension_numbers<[1], [0], [0], [1], [0, 0, 1, 1], [], []>} : vector<16x16xbf16>, vector<16x128xbf16>, vector<16x128xf32> -> vector<16x128xf32>
    %23 = vector.broadcast %18 : vector<1x128xf32> to vector<16x128xf32>
    %24 = arith.addf %22, %23 : vector<16x128xf32>
    %25 = vector.broadcast %3 : vector<16x1xf32> to vector<16x128xf32>
    %26 = arith.mulf %24, %25 : vector<16x128xf32>
    %c0_19 = arith.constant 0 : index
    %c0_20 = arith.constant 0 : index
    %27 = vector.load %arg8[%c0_19, %c0_20] : memref<128x128xbf16, #tpu.memory_space<vmem>>, vector<128x128xbf16>
    %c0_21 = arith.constant 0 : index
    %c0_22 = arith.constant 0 : index
    %28 = vector.load %arg9[%c0_21, %c0_22] : memref<1x128xf32, #tpu.memory_space<vmem>>, vector<1x128xf32>
    %29 = arith.truncf %26 : vector<16x128xf32> to vector<16x128xbf16>
    %cst_23 = arith.constant dense<0.000000e+00> : vector<16x128xf32>
    %30 = tpu.matmul %29, %27, %cst_23 {dimension_numbers = #tpu.dot_dimension_numbers<[1], [0], [0], [1], [0, 0, 1, 1], [], []>} : vector<16x128xbf16>, vector<128x128xbf16>, vector<16x128xf32> -> vector<16x128xf32>
    %31 = arith.truncf %30 : vector<16x128xf32> to vector<16x128xbf16>
    %cst_24 = arith.constant dense<0.000000e+00> : vector<16x128xf32>
    %32 = tpu.matmul %1, %31, %cst_24 {dimension_numbers = #tpu.dot_dimension_numbers<[1], [0], [0], [1], [0, 0, 1, 1], [], []>} : vector<16x16xbf16>, vector<16x128xbf16>, vector<16x128xf32> -> vector<16x128xf32>
    %33 = vector.broadcast %28 : vector<1x128xf32> to vector<16x128xf32>
    %34 = arith.addf %32, %33 : vector<16x128xf32>
    %35 = vector.broadcast %3 : vector<16x1xf32> to vector<16x128xf32>
    %36 = arith.mulf %34, %35 : vector<16x128xf32>
    %c0_25 = arith.constant 0 : index
    %c0_26 = arith.constant 0 : index
    %37 = vector.load %arg10[%c0_25, %c0_26] : memref<128x128xbf16, #tpu.memory_space<vmem>>, vector<128x128xbf16>
    %c0_27 = arith.constant 0 : index
    %c0_28 = arith.constant 0 : index
    %38 = vector.load %arg11[%c0_27, %c0_28] : memref<1x128xf32, #tpu.memory_space<vmem>>, vector<1x128xf32>
    %cst_29 = arith.constant dense<0xFF800000> : vector<128xf32>
    %39 = vector.multi_reduction <maximumf>, %36, %cst_29 [0] : vector<16x128xf32> to vector<128xf32>
    %40 = vector.shape_cast %39 : vector<128xf32> to vector<1x128xf32>
    %41 = arith.truncf %40 : vector<1x128xf32> to vector<1x128xbf16>
    %cst_30 = arith.constant dense<0.000000e+00> : vector<1x128xf32>
    %42 = tpu.matmul %41, %37, %cst_30 {dimension_numbers = #tpu.dot_dimension_numbers<[1], [0], [0], [1], [0, 0, 1, 1], [], []>} : vector<1x128xbf16>, vector<128x128xbf16>, vector<1x128xf32> -> vector<1x128xf32>
    %43 = arith.addf %42, %38 : vector<1x128xf32>
    %c0_31 = arith.constant 0 : index
    %c0_32 = arith.constant 0 : index
    %c0_33 = arith.constant 0 : index
    %44 = vector.load %arg12[%c0_31, %c0_32, %c0_33] : memref<1x1x128xf32, #tpu.memory_space<vmem>>, vector<1x1x128xf32>
    %45 = vector.shape_cast %44 : vector<1x1x128xf32> to vector<1x128xf32>
    %46 = vector.shape_cast %43 : vector<1x128xf32> to vector<1x1x128xf32>
    tpu.vector_store %arg12[%c0_31, %c0_32, %c0_33], %46 {strides = array<i32>} : memref<1x1x128xf32, #tpu.memory_space<vmem>>, vector<1x1x128xf32>,
    return
  }
  func.func @transform_0(%arg0: i32) -> (i32, i32, i32) {
    %c0_i32 = arith.constant 0 : i32
    %c0_i32_0 = arith.constant 0 : i32
    %c0_i32_1 = arith.constant 0 : i32
    return %arg0, %c0_i32, %c0_i32_0 : i32, i32, i32
  }
  func.func @transform_1(%arg0: i32) -> (i32, i32, i32) {
    %c0_i32 = arith.constant 0 : i32
    %c0_i32_0 = arith.constant 0 : i32
    %c0_i32_1 = arith.constant 0 : i32
    return %arg0, %c0_i32, %c0_i32_0 : i32, i32, i32
  }
  func.func @transform_2(%arg0: i32) -> (i32, i32, i32) {
    %c0_i32 = arith.constant 0 : i32
    %c0_i32_0 = arith.constant 0 : i32
    %c0_i32_1 = arith.constant 0 : i32
    return %arg0, %c0_i32, %c0_i32_0 : i32, i32, i32
  }
  func.func @transform_3(%arg0: i32) -> (i32, i32) {
    %c0_i32 = arith.constant 0 : i32
    %c0_i32_0 = arith.constant 0 : i32
    %c0_i32_1 = arith.constant 0 : i32
    return %c0_i32, %c0_i32_0 : i32, i32
  }
  func.func @transform_4(%arg0: i32) -> (i32, i32) {
    %c0_i32 = arith.constant 0 : i32
    %c0_i32_0 = arith.constant 0 : i32
    %c0_i32_1 = arith.constant 0 : i32
    return %c0_i32, %c0_i32_0 : i32, i32
  }
  func.func @transform_5(%arg0: i32) -> (i32, i32) {
    %c0_i32 = arith.constant 0 : i32
    %c0_i32_0 = arith.constant 0 : i32
    %c0_i32_1 = arith.constant 0 : i32
    return %c0_i32, %c0_i32_0 : i32, i32
  }
  func.func @transform_6(%arg0: i32) -> (i32, i32) {
    %c0_i32 = arith.constant 0 : i32
    %c0_i32_0 = arith.constant 0 : i32
    %c0_i32_1 = arith.constant 0 : i32
    return %c0_i32, %c0_i32_0 : i32, i32
  }
  func.func @transform_7(%arg0: i32) -> (i32, i32) {
    %c0_i32 = arith.constant 0 : i32
    %c0_i32_0 = arith.constant 0 : i32
    %c0_i32_1 = arith.constant 0 : i32
    return %c0_i32, %c0_i32_0 : i32, i32
  }
  func.func @transform_8(%arg0: i32) -> (i32, i32) {
    %c0_i32 = arith.constant 0 : i32
    %c0_i32_0 = arith.constant 0 : i32
    %c0_i32_1 = arith.constant 0 : i32
    return %c0_i32, %c0_i32_0 : i32, i32
  }
  func.func @transform_9(%arg0: i32) -> (i32, i32) {
    %c0_i32 = arith.constant 0 : i32
    %c0_i32_0 = arith.constant 0 : i32
    %c0_i32_1 = arith.constant 0 : i32
    return %c0_i32, %c0_i32_0 : i32, i32
  }
  func.func @transform_10(%arg0: i32) -> (i32, i32) {
    %c0_i32 = arith.constant 0 : i32
    %c0_i32_0 = arith.constant 0 : i32
    %c0_i32_1 = arith.constant 0 : i32
    return %c0_i32, %c0_i32_0 : i32, i32
  }
  func.func @transform_11(%arg0: i32) -> (i32, i32, i32) {
    %c0_i32 = arith.constant 0 : i32
    %c0_i32_0 = arith.constant 0 : i32
    %c0_i32_1 = arith.constant 0 : i32
    return %arg0, %c0_i32, %c0_i32_0 : i32, i32, i32
  }
}

</mosaic_0001>

<bundles_post_ra>
// kernel: gcn_forward.1
= control target key start
LH: loop header
LB: loop body
LE: loop exit
PB: predicated region body
PF: predicated region fallthrough
CT: control target
= control target key end

     0   :  { %16 = vsyncpa [#allocation3], 0  ;;  %s1815_s0 = inlined_call_operand.vmem [shape: bf16[2,16,16], index: 0, kind: input, shape index: {}]   ;;  %s1816_s1 = inlined_call_operand.vmem [shape: bf16[2,16,128], index: 1, kind: input, shape index: {}]   ;;  %s1817_s2 = inlined_call_operand.vmem [shape: f32[2,16,1], index: 2, kind: input, shape index: {}]   ;;  %s1818_s3 = inlined_call_operand.vmem [shape: bf16[128,128], index: 3, kind: input, shape index: {}]   ;;  %s1819_s4 = inlined_call_operand.vmem [shape: f32[1,128], index: 4, kind: input, shape index: {}]   ;;  %s1820_s5 = inlined_call_operand.vmem [shape: bf16[128,128], index: 5, kind: input, shape index: {}]   ;;  %s1821_s6 = inlined_call_operand.vmem [shape: f32[1,128], index: 6, kind: input, shape index: {}]   ;;  %s1822_s7 = inlined_call_operand.vmem [shape: bf16[128,128], index: 7, kind: input, shape index: {}]   ;;  %s1823_s8 = inlined_call_operand.vmem [shape: f32[1,128], index: 8, kind: input, shape index: {}]   ;;  %s1824_s9 = inlined_call_operand.vmem [shape: bf16[128,128], index: 9, kind: input, shape index: {}]   ;;  %s1825_s10 = inlined_call_operand.vmem [shape: f32[1,128], index: 10, kind: input, shape index: {}]   ;;  %s1826_s11 = inlined_call_operand.hbm [shape: f32[2,1,128], index: 11, kind: output, shape index: {}]  }
   0x1   :  { %18 = vsyncpa [#allocation3 + $0x1], 0  ;;  %s1531_s17 = smov 0   ;;  %s1533_s18 = smov 0  }
   0x2   :  { %s1535_s19 = smov 0   ;;  %s1537_s20 = smov 0  }
   0x3 LB: > { %1828 = sst [smem:[#allocation5_spill]] %s1461_s19  ;;  %s1552_s21 = sadd.s32 4294967295, %s1465_s20   ;;  %s1465_s20 = sphi %s1537_s20, %s1836_s20   ;;  %s1461_s19 = sphi %s1535_s19, %s1833_s19   ;;  %s1457_s18 = sphi %s1533_s18, %s1835_s18   ;;  %s1453_s17 = sphi %s1531_s17, %s1834_s17  }
   0x4   : > { %s1132_s22 = sadd.s32 4294967294, %s1465_s20   ;;  %s1556_s23 = sadd.s32 1, %s1465_s20  }
   0x5   : > { %s277_s24 = sadd.s32 1, %s1461_s19  ;;  %s274_s25 = ssub.s32 %s1465_s20, %s1556_s23 }
   0x6   : > { %p287_p0 = scmp.ne.s32.totalorder %s1461_s19, %s1457_s18  ;;  %p275_p1 = scmp.eq.s32.totalorder %s274_s25, 0 }
   0x7   : > { %p288_p2 = scmp.eq.s32.totalorder %s1552_s21, 1  ;;  %p293_p3 = scmp.ne.s32.totalorder %s1457_s18, %s1453_s17 }
   0x8   : > { %p294_p4 = scmp.eq.s32.totalorder %s1132_s22, 1  ;;  %p1135_p7 = scmp.ge.s32.totalorder %s1465_s20, 1 }
   0x9   : > { %s1567_s26 = scalar_select %p275_p1, %s1461_s19, %s277_s24  }
   0xa   : > { %p1569_p5 = por %p288_p2, %p287_p0  ;;  %p1573_p6 = por %p294_p4, %p293_p3 }
   0xb   : > { %1829 = sst [smem:[#allocation6_spill]] %s1567_s26  ;;  %p360_p8 = scmp.lt.s32.totalorder %s1465_s20, 3 }
   0xd   : > { %p361_p9 = pnand %p1135_p7, %p360_p8 }
   0xe   : > { %p409_p10 = scmp.lt.s32.totalorder (!%p361_p9), %s1552_s21, 1  ;;  %s407_s25 = sand.u32 (!%p361_p9), 1, %s1457_s18  }
   0xf   : > { %364 = sbr.rel (%p361_p9) target bundleno = 1463 (0x5b7), region = 64  ;;  %s1182_s13 = sshll.u32 (!%p361_p9), %s1552_s21, 4 }
  0x10   : > { %s408_s14 = scalar_lea.vmem (!%p361_p9), [#allocation2], %s407_s25  ;;  %s1774_s16 = scalar_lea.hbm (!%p361_p9), %s1826_s11, %s1182_s13 }
  0x11   : > { %s1053_s19 = sshll.u32 (!%p361_p9), %s408_s14, 4  ;;  %s1041_s22 = scalar_lea.sflag (!%p361_p9), [#allocation3], %s407_s25  ;;  %s1776_s19 = int_to_ptr.vmem [resolvable:$true] %s1053_s19 }
  0x14   : > { %v1467_v0 = vmov 0.0   ;;  %vm1468_vm0 = vmmov 0   ;;  %v1373_v1 = vld [vmem:[%s1818_s3 + $0x38] sm:$0xff]   ;;  %s1587_s12 = scalar_select %p409_p10, %s1552_s21, 1  ;;  %v1374_v2 = vld [vmem:[%s1818_s3 + $0x30] sm:$0xff]   ;;  %v1375_v4 = vld [vmem:[%s1818_s3 + $0x28] sm:$0xff]  }
  0x15   : > { %1230 = vmatprep.subr.bf16.mxu0 %v1467_v0  ;;  %1232 = vmatprep.mubr.msk.bf16.mxu0 %vm1468_vm0, %v1467_v0  ;;  %vm459_vm1 = vcmask 130048   ;;  %v1376_v6 = vld [vmem:[%s1818_s3 + $0x20] sm:$0xff]   ;;  %v1377_v7 = vld [vmem:[%s1818_s3 + $0x18] sm:$0xff]   ;;  %v1378_v8 = vld [vmem:[%s1818_s3 + $0x10] sm:$0xff]   ;;  %v1469_v12 = vmov 0   ;;  %s1470_s21 = smov [#allocation2]  }
  0x16   : > { %1236 = vmatprep.subr.bf16.mxu1 %v1467_v0  ;;  %1252 = vmatprep.mubr.msk.bf16.mxu1 %vm1468_vm0, %v1467_v0  ;;  %s1185_s15 = sshll.u32 %s1587_s12, 3  ;;  %v1379_v9 = vld [vmem:[%s1818_s3 + $0x8] sm:$0xff]   ;;  %v1380_v10 = vld [vmem:[%s1818_s3] sm:$0xff]   ;;  %v1381_v11 = vld [vmem:[%s1820_s5 + $0x38] sm:$0xff]  }
  0x17   : > { %1237 = vmatpush3.bf16.msra.mxu1 %v1373_v1  ;;  %s413_s24 = scalar_lea.vmem %s1815_s0, %s1185_s15  ;;  %s418_s30 = scalar_lea.vmem %s1816_s1, %s1185_s15  ;;  %1370 = vset.pattern.permute.xlu0 %v1469_v12  ;;  %v1382_v14 = vld [vmem:[%s1820_s5 + $0x30] sm:$0xff]   ;;  %v1383_v16 = vld [vmem:[%s1820_s5 + $0x28] sm:$0xff]   ;;  %v1384_v17 = vld [vmem:[%s1820_s5 + $0x20] sm:$0xff]  }
  0x18   : > { %1238 = vmatprep.subr.bf16.mxu1 %v1467_v0  ;;  %v1371_v3 = vld [vmem:[%s418_s30] sm:$0xff]   ;;  %s1187_s30 = sshll.u32 %s1587_s12, 4  ;;  %v1385_v18 = vld [vmem:[%s1820_s5 + $0x18] sm:$0xff]   ;;  %v1386_v24 = vld [vmem:[%s1820_s5 + $0x10] sm:$0xff]   ;;  %s1405_s12 = scalar_lea.vmem %s1776_s19, 16 }
  0x19   : > { %v1606_v5 = vld [vmem:[%s413_s24] sm:$0xff]   ;;  %1231 = vmatpush3.bf16.msra.mxu0 %v1371_v3  ;;  %s423_s15 = scalar_lea.vmem %s1817_s2, %s1187_s30  ;;  %v1387_v25 = vld [vmem:[%s1820_s5 + $0x8] sm:$0xff]   ;;  %v1389_v44 = vld [vmem:[%s1822_s7 + $0x38] sm:$0xff]   ;;  %p1406_p11 = scmp.ne.s32.totalorder %s1776_s19, %s1405_s12 }
  0x1a   : > { %1256 = vmatprep.subr.bf16.mxu0 %v1467_v0  ;;  %v427_v13 = vld [vmem:[%s423_s15] sm:$0xff]  ;;  %v428_v15 = vld [vmem:[%s423_s15 + $0x8] sm:$0xff]  ;;  %v1390_v45 = vld [vmem:[%s1822_s7 + $0x30] sm:$0xff]   ;;  %s1409_s24 = sshll.u32 %s1470_s21, 4  ;;  %s1410_s24 = int_to_ptr.vmem [resolvable:$false] %s1409_s24 }
  0x1b   : > { %1239 = vmatpush3.bf16.msra.mxu1 %v1374_v2  ;;  %602 = vperm.xlu0 %1370, %v427_v13   ;;  %v1388_v26 = vld [vmem:[%s1820_s5] sm:$0xff]   ;;  %v1391_v46 = vld [vmem:[%s1822_s7 + $0x28] sm:$0xff]   ;;  %v1393_v48 = vld [vmem:[%s1822_s7 + $0x18] sm:$0xff]   ;;  %p1407_p12 = pnand %p1406_p11, %p1569_p5  ;;  %s1411_s29 = scalar_lea.vmem %s1410_s24, 32 }
  0x1c   : > { %1240 = vmatprep.subr.bf16.mxu1 %v1467_v0  ;;  %1233 = vmatmul.mubr.msk.bf16.vlgmr.msra.gmra.mxu0 %vm459_vm1, %v1606_v5  ;;  %v1145_v28 = vld [vmem:[%s1819_s4] ss:$0 sm:$0xff]  ;;  %v1394_v49 = vld [vmem:[%s1822_s7 + $0x10] sm:$0xff]   ;;  %v1395_v50 = vld [vmem:[%s1822_s7 + $0x8] sm:$0xff]   ;;  %p1412_p0 = scmp.lt.s32.totalorder %s1776_s19, %s1410_s24  ;;  %p1413_p1 = scmp.lt.s32.totalorder %s1411_s29, %s1405_s12 }
  0x1d   : > { %1272 = vmatprep.mubr.msk.bf16.mxu0 %vm1468_vm0, %v1467_v0  ;;  %1257 = vmatpush3.bf16.msra.mxu0 %v1381_v11  ;;  %v1392_v47 = vld [vmem:[%s1822_s7 + $0x20] sm:$0xff]   ;;  %p1408_p13 = pneg %p1407_p12 }
  0x1e   : > { %1258 = vmatprep.subr.bf16.mxu0 %v1467_v0  ;;  %v1396_v51 = vld [vmem:[%s1822_s7] sm:$0xff]   ;;  %p1414_p2 = por %p1413_p1, %p1412_p0 }
  0x1f   : > { %1241 = vmatpush3.bf16.msra.mxu1 %v1375_v4  ;;  %607 = vperm.xlu0 %1370, %v428_v15   ;;  %v1162_v52 = vld [vmem:[%s1821_s6] ss:$0 sm:$0xff]  ;;  %v1397_v4 = vld [vmem:[%s1824_s9 + $0x38] sm:$0xff]  }
  0x20   : > { %1242 = vmatprep.subr.bf16.mxu1 %v1467_v0  ;;  %v1404_v11 = vld [vmem:[%s1824_s9] sm:$0xff]   ;;  %p1415_p3 = pnand %p1414_p2, %p1408_p13 }
  0x21   : > { %1259 = vmatpush3.bf16.msra.mxu0 %v1382_v14  ;;  %v1172_v12 = vld [vmem:[%s1823_s8] ss:$0 sm:$0xff] }
  0x22   : > { %1260 = vmatprep.subr.bf16.mxu0 %v1467_v0 }
  0x23   : > { %1243 = vmatpush3.bf16.msra.mxu1 %v1376_v6  ;;  %v1398_v6 = vld [vmem:[%s1824_s9 + $0x30] sm:$0xff]  }
  0x24   : > { %1244 = vmatprep.subr.bf16.mxu1 %v1467_v0 }
  0x25   : > { %1261 = vmatpush3.bf16.msra.mxu0 %v1383_v16 }
  0x26   : > { %1262 = vmatprep.subr.bf16.mxu0 %v1467_v0 }
  0x27   : > { %1245 = vmatpush3.bf16.msra.mxu1 %v1377_v7  ;;  %v1399_v7 = vld [vmem:[%s1824_s9 + $0x28] sm:$0xff]  }
  0x28   : > { %1246 = vmatprep.subr.bf16.mxu1 %v1467_v0 }
  0x29   : > { %1263 = vmatpush3.bf16.msra.mxu0 %v1384_v17 }
  0x2a   : > { %1264 = vmatprep.subr.bf16.mxu0 %v1467_v0 }
  0x2b   : > { %1247 = vmatpush3.bf16.msra.mxu1 %v1378_v8  ;;  %v1401_v8 = vld [vmem:[%s1824_s9 + $0x18] sm:$0xff]  }
  0x2c   : > { %1248 = vmatprep.subr.bf16.mxu1 %v1467_v0 }
  0x2d   : > { %1265 = vmatpush3.bf16.msra.mxu0 %v1385_v18 }
  0x2e   : > { %1266 = vmatprep.subr.bf16.mxu0 %v1467_v0 }
  0x2f   : > { %1249 = vmatpush3.bf16.msra.mxu1 %v1379_v9  ;;  %v1402_v9 = vld [vmem:[%s1824_s9 + $0x10] sm:$0xff]  }
  0x30   : > { %1250 = vmatprep.subr.bf16.mxu1 %v1467_v0 }
  0x31   : > { %1267 = vmatpush3.bf16.msra.mxu0 %v1386_v24 }
  0x32   : > { %1268 = vmatprep.subr.bf16.mxu0 %v1467_v0 }
  0x33   : > { %1251 = vmatpush3.bf16.msra.mxu1 %v1380_v10  ;;  %v1403_v10 = vld [vmem:[%s1824_s9 + $0x8] sm:$0xff]  }
  0x34   : > { %1302 = vmatprep.subr.bf16.mxu1 %v1467_v0 }
  0x35   : > { %1269 = vmatpush3.bf16.msra.mxu0 %v1387_v25 }
  0x36   : > { %1270 = vmatprep.subr.bf16.mxu0 %v1467_v0 }
  0x39   : > { %1271 = vmatpush3.bf16.msra.mxu0 %v1388_v26 }
  0x3a   : > { %1276 = vmatprep.subr.bf16.mxu0 %v1467_v0 }
  0x96   : > { %v1673_v27 = vpop.permute.xlu0 %602 }
  0x9a   : > { %v1678_v34 = vpop.permute.xlu0 %607 }
  0xdc   : > { %v497_v19 = vpop.f32.mrf.mxu0 }
  0xde   : > { %v1234_v20 = vpop.f32.mrf.mxu0 }
  0xe0   : > { %v500_v21 = vpop.f32.mrf.mxu0 }
  0xe1   : > { %v504_v22 = vpack.c.bf16 %v500_v21, %v497_v19 }
  0xe2   : > { %v1235_v23 = vpop.f32.mrf.mxu0 }
  0xe3   : > { %1253 = vmatmul.mubr.bf16.vlgmr.msra.gmra.mxu1 %v504_v22 }
  0xe4   : > { %1304 = vmatprep.mubr.msk.bf16.mxu1 %vm1468_vm0, %v1467_v0 }
 0x1a3   : > { %v593_v29 = vpop.f32.mrf.mxu1 }
 0x1a4   : > { %v594_v31 = vadd.f32 %v1145_v28, %v593_v29  ;;  %v942_v29 = vld [vmem:[%s1825_s10] sm:$0x1] }
 0x1a5   : > { %v1254_v30 = vpop.f32.mrf.mxu1 }
 0x1a6   : > { %v610_v36 = vmul.f32 %v1673_v27, %v594_v31 }
 0x1a7   : > { %v596_v32 = vpop.f32.mrf.mxu1 }
 0x1a8   : > { %v597_v33 = vadd.f32 %v1145_v28, %v596_v32 }
 0x1a9   : > { %v1255_v35 = vpop.f32.mrf.mxu1 }
 0x1aa   : > { %v611_v37 = vmul.f32 %v1678_v34, %v597_v33 }
 0x1ac   : > { %v629_v38 = vpack.c.bf16 %v611_v37, %v610_v36 }
 0x1ae   : > { %1273 = vmatmul.mubr.bf16.vlgmr.msra.gmra.mxu0 %v629_v38 }
 0x1af   : > { %1278 = vmatprep.mubr.msk.bf16.mxu0 %vm1468_vm0, %v1467_v0 }
 0x26e   : > { %v712_v39 = vpop.f32.mrf.mxu0 }
 0x270   : > { %v1274_v40 = vpop.f32.mrf.mxu0 }
 0x272   : > { %v715_v41 = vpop.f32.mrf.mxu0 }
 0x273   : > { %v719_v42 = vpack.c.bf16 %v715_v41, %v712_v39 }
 0x274   : > { %v1275_v43 = vpop.f32.mrf.mxu0 }
 0x275   : > { %1277 = vmatpush3.bf16.msra.mxu0 %v719_v42 }
 0x276   : > { %1282 = vmatprep.subr.bf16.mxu0 %v1467_v0 }
 0x278   : > { %1279 = vmatmul.mubr.msk.bf16.vlgmr.msra.gmra.mxu0 %vm459_vm1, %v1606_v5 }
 0x279   : > { %1283 = vmatpush3.bf16.msra.mxu0 %v1389_v44  ;;  %1298 = vmatprep.mubr.msk.bf16.mxu0 %vm1468_vm0, %v1467_v0 }
 0x27a   : > { %1284 = vmatprep.subr.bf16.mxu0 %v1467_v0 }
 0x27d   : > { %1285 = vmatpush3.bf16.msra.mxu0 %v1390_v45 }
 0x27e   : > { %1286 = vmatprep.subr.bf16.mxu0 %v1467_v0 }
 0x281   : > { %1287 = vmatpush3.bf16.msra.mxu0 %v1391_v46 }
 0x282   : > { %1288 = vmatprep.subr.bf16.mxu0 %v1467_v0 }
 0x285   : > { %1289 = vmatpush3.bf16.msra.mxu0 %v1392_v47 }
 0x286   : > { %1290 = vmatprep.subr.bf16.mxu0 %v1467_v0 }
 0x289   : > { %1291 = vmatpush3.bf16.msra.mxu0 %v1393_v48 }
 0x28a   : > { %1292 = vmatprep.subr.bf16.mxu0 %v1467_v0 }
 0x28d   : > { %1293 = vmatpush3.bf16.msra.mxu0 %v1394_v49 }
 0x28e   : > { %1294 = vmatprep.subr.bf16.mxu0 %v1467_v0 }
 0x291   : > { %1295 = vmatpush3.bf16.msra.mxu0 %v1395_v50 }
 0x292   : > { %1296 = vmatprep.subr.bf16.mxu0 %v1467_v0 }
 0x295   : > { %1297 = vmatpush3.bf16.msra.mxu0 %v1396_v51 }
 0x338   : > { %v760_v53 = vpop.f32.mrf.mxu0 }
 0x339   : > { %v761_v55 = vadd.f32 %v1162_v52, %v760_v53 }
 0x33a   : > { %v1280_v54 = vpop.f32.mrf.mxu0 }
 0x33b   : > { %v767_v59 = vmul.f32 %v761_v55, %v1673_v27 }
 0x33c   : > { %v763_v56 = vpop.f32.mrf.mxu0 }
 0x33d   : > { %v764_v57 = vadd.f32 %v1162_v52, %v763_v56 }
 0x33e   : > { %v1281_v58 = vpop.f32.mrf.mxu0 }
 0x33f   : > { %v768_v60 = vmul.f32 %v764_v57, %v1678_v34 }
 0x341   : > { %v786_v61 = vpack.c.bf16 %v768_v60, %v767_v59 }
 0x343   : > { %1299 = vmatmul.mubr.bf16.vlgmr.msra.gmra.mxu0 %v786_v61 }
 0x403   : > { %v869_v62 = vpop.f32.mrf.mxu0 }
 0x405   : > { %v1300_v63 = vpop.f32.mrf.mxu0 }
 0x407   : > { %v872_v1 = vpop.f32.mrf.mxu0 }
 0x408   : > { %v876_v2 = vpack.c.bf16 %v872_v1, %v869_v62 }
 0x409   : > { %v1301_v3 = vpop.f32.mrf.mxu0 }
 0x40a   : > { %1303 = vmatpush3.bf16.msra.mxu1 %v876_v2 }
 0x40b   : > { %1308 = vmatprep.subr.bf16.mxu1 %v1467_v0 }
 0x40d   : > { %1305 = vmatmul.mubr.msk.bf16.vlgmr.msra.gmra.mxu1 %vm459_vm1, %v1606_v5  ;;  %v1400_v5 = vld [vmem:[%s1824_s9 + $0x20] sm:$0xff]  }
 0x40e   : > { %1309 = vmatpush3.bf16.msra.mxu1 %v1397_v4  ;;  %1324 = vmatprep.mubr.msk.bf16.mxu1 %vm1468_vm0, %v1467_v0 }
 0x40f   : > { %1310 = vmatprep.subr.bf16.mxu1 %v1467_v0 }
 0x412   : > { %1311 = vmatpush3.bf16.msra.mxu1 %v1398_v6 }
 0x413   : > { %1312 = vmatprep.subr.bf16.mxu1 %v1467_v0 }
 0x416   : > { %1313 = vmatpush3.bf16.msra.mxu1 %v1399_v7 }
 0x417   : > { %1314 = vmatprep.subr.bf16.mxu1 %v1467_v0 }
 0x41a   : > { %1315 = vmatpush3.bf16.msra.mxu1 %v1400_v5 }
 0x41b   : > { %1316 = vmatprep.subr.bf16.mxu1 %v1467_v0 }
 0x41e   : > { %1317 = vmatpush3.bf16.msra.mxu1 %v1401_v8 }
 0x41f   : > { %1318 = vmatprep.subr.bf16.mxu1 %v1467_v0 }
 0x422   : > { %1319 = vmatpush3.bf16.msra.mxu1 %v1402_v9 }
 0x423   : > { %1320 = vmatprep.subr.bf16.mxu1 %v1467_v0 }
 0x426   : > { %1321 = vmatpush3.bf16.msra.mxu1 %v1403_v10 }
 0x427   : > { %1322 = vmatprep.subr.bf16.mxu1 %v1467_v0 }
 0x42a   : > { %1323 = vmatpush3.bf16.msra.mxu1 %v1404_v11 }
 0x4cd   : > { %v917_v13 = vpop.f32.mrf.mxu1 }
 0x4ce   : > { %v918_v15 = vadd.f32 %v1172_v12, %v917_v13 }
 0x4cf   : > { %v1306_v14 = vpop.f32.mrf.mxu1 }
 0x4d0   : > { %v924_v19 = vmul.f32 %v918_v15, %v1673_v27 }
 0x4d1   : > { %v920_v16 = vpop.f32.mrf.mxu1 }
 0x4d2   : > { %v921_v17 = vadd.f32 %v1172_v12, %v920_v16 }
 0x4d3   : > { %v1307_v18 = vpop.f32.mrf.mxu1 }
 0x4d4   : > { %v925_v20 = vmul.f32 %v921_v17, %v1678_v34 }
 0x4d6   : > { %v943_v21 = vmax.f32 %v924_v19, %v925_v20 }
 0x4d8   : > { %v944_v22 = vrot.slane %v943_v21, 4 }
 0x4da   : > { %v945_v0 = vmax.f32 %v943_v21, %v944_v22 }
 0x4dc   : > { %v946_v23 = vrot.slane %v945_v0, 2 }
 0x4de   : > { %v947_v24 = vmax.f32 %v945_v0, %v946_v23 }
 0x4e0   : > { %v948_v25 = vrot.slane %v947_v24, 1 }
 0x4e2   : > { %v949_v26 = vmax.f32 %v947_v24, %v948_v25 }
 0x4e4   : > { %v950_v28 = vpack.c.bf16 %v949_v26, %v949_v26 }
 0x4e6   : > { %1325 = vmatmul.mubr.bf16.vlgmr.msra.gmra.mxu1 %v950_v28 }
 0x5a6   : > { %v1033_v27 = vpop.f32.mrf.mxu1 }
 0x5a7   : > { %v1034_v30 = vadd.f32 %v1033_v27, %v942_v29 }
 0x5a8   : > { %v1326_v31 = vpop.f32.mrf.mxu1 }
 0x5a9   : > { %1039 = vst [vmem:[%s408_s14] sm:$0x1] %v1034_v30 }
 0x5aa   : > { %v1036_v32 = vpop.f32.mrf.mxu1 }
 0x5ab   : > { %1418 = shalt.err (!%p1415_p3)
}
 0x5ac   : > { %s1419_s30 = scalar_lea.hbm %s1774_s16, 16  ;;  %s1423_s14 = scalar_lea.hbm %s1826_s11, 32 }
 0x5ad   : > { %p1420_p4 = scmp.ne.s32.totalorder %s1774_s16, %s1419_s30  ;;  %p1424_p9 = scmp.lt.s32.totalorder %s1774_s16, %s1826_s11 }
 0x5ae   : > { %p1425_p10 = scmp.lt.s32.totalorder %s1423_s14, %s1419_s30 }
 0x5af   : > { %p1421_p7 = pnand %p1420_p4, %p1569_p5 }
 0x5b0   : > { %p1426_p11 = por %p1425_p10, %p1424_p9 }
 0x5b1   : > { %p1422_p8 = pneg %p1421_p7 }
 0x5b3   : > { %p1427_p12 = pnand %p1426_p11, %p1422_p8 }
 0x5b5   : > { %1430 = shalt.err (!%p1427_p12)
}
 0x5b6   : > { %1328 = dma.vmem_to_hbm [thread:$0]  (%p1569_p5), %s1776_s19, 16, %s1774_s16, %s1041_s22   ;;  %v1327_v33 = vpop.f32.mrf.mxu1 }
 0x5b7 PF: > { %p1334_p13 = scmp.ge.s32.totalorder %s1465_s20, 2  ;;  %s1065_s12 = sand.u32 1, %s1453_s17  }
 0x5b8   : > { %s1066_s21 = scalar_lea.sflag [#allocation3], %s1065_s12 }
 0x5b9   : > { %p1331_p0 = pnand %p1334_p13, %p1573_p6 }
 0x5bb   : > { %p1332_p1 = pneg %p1331_p0 }
 0x5bd   : > { %1448 = dma.done.wait (%p1332_p1), %s1066_s21, 16  }
 0x5be   : > { %1450 = vsyncadd (%p1332_p1), %s1066_s21, 4294967280  ;;  %s1832_s24 = sld [smem:[#allocation5_spill]]  ;;  %p21_p2 = scmp.ge.s32.totalorder %s1556_s23, 4  }
 0x5bf   : > { %s1833_s19 = sld [smem:[#allocation6_spill]]  ;;  %s1834_s17 = smov %s1457_s18 }
 0x5c0   : > { %s1836_s20 = smov %s1556_s23  ;;  %23 = sbr.rel (!%p21_p2) target bundleno = 3 (0x3), region = 105 }
 0x5c4   : > { %s1835_s18 = smov %s1832_s24 }
 0x5c5   :  { %1070 = vsyncpa [#allocation3], 1 }
 0x5c6   :  { %1072 = vsyncpa [#allocation3 + $0x1], 1 }

</bundles_post_ra>
